<compile_context>
chip_gen: v5e
topology: v5e:2x2
jax: 0.10.0
libtpu: 0.0.40
codegen_flags: <defaults>
</compile_context>

<pallas_src>
import math
from typing import Iterable, Union

import numpy as np
import jax
import jax.numpy as jnp
from jax.experimental import pallas as pl
from jax.experimental.pallas import tpu as pltpu


# Per-grid-step VMEM footprint target (input + output blocks, double-buffered).
_VMEM_STEP_BUDGET = 8 * 1024 * 1024


# ---------------------------------------------------------------------------
# Pallas kernel: constant-pad one [rows, Hb, Wb] block into [rows, THb, TWb],
# placing the data window at (off_h, off_w).
# ---------------------------------------------------------------------------
def _make_pad_kernel(Hb, Wb, THb, TWb, off_h, off_w, pad_value):
    pad_top, pad_bot = off_h, THb - Hb - off_h
    pad_left, pad_right = off_w, TWb - Wb - off_w

    def kernel(x_ref, o_ref):
        dt = o_ref.dtype
        r = o_ref.shape[0]
        # Single store of the data window (each output element written once).
        o_ref[:, off_h:off_h + Hb, off_w:off_w + Wb] = x_ref[...].astype(dt)
        # Fill only the pad stripes (static conditions -> emitted only if needed).
        # Top/bottom stripes are full lane width (lane-dense stores).
        if pad_top:
            o_ref[:, :pad_top, :] = jnp.full((r, pad_top, TWb), pad_value, dt)
        if pad_bot:
            o_ref[:, off_h + Hb:, :] = jnp.full((r, pad_bot, TWb), pad_value, dt)
        if pad_left:
            o_ref[:, off_h:off_h + Hb, :pad_left] = jnp.full((r, Hb, pad_left), pad_value, dt)
        if pad_right:
            o_ref[:, off_h:off_h + Hb, off_w + Wb:] = jnp.full((r, Hb, pad_right), pad_value, dt)

    return kernel


def _pad_hw(x3d: jax.Array, TH: int, TW: int, off_h: int, off_w: int,
            pad_value) -> jax.Array:
    """Constant-pad the trailing two axes of [R, H, W] -> [R, TH, TW]."""
    R, H, W = x3d.shape
    dtype = x3d.dtype
    itemsize = jnp.dtype(dtype).itemsize

    if x3d.size == 0 or R * TH * TW == 0:
        return jnp.full((R, TH, TW), pad_value, dtype)

    budget = _VMEM_STEP_BUDGET
    h_free = (TH == H and off_h == 0)   # sublane axis is a pure pass-through
    w_free = (TW == W and off_w == 0)   # lane axis is a pure pass-through

    bh_in, bh_out = H, TH               # block extents along the trailing axes
    bw_in, bw_out = W, TW

    per_row = 2 * (H * W + TH * TW) * itemsize   # x2: double-buffered pipeline
    if per_row <= budget:
        tile_r = max(1, min(R, budget // per_row))
    else:
        tile_r = 1
        # A single [H, W] slab is over budget: tile the *unpadded* trailing
        # axis at hardware granularity (Pallas clips boundary blocks, so no
        # remainder handling is needed in-kernel).
        sub_mult = max(8, 32 // max(itemsize, 1))   # packed-dtype sublane tile
        if w_free:
            denom = max(2 * (H + TH) * itemsize, 1)
            tw = (budget // denom) // 128 * 128
            if 0 < tw < W:
                bw_in = bw_out = tw
        elif h_free:
            denom = max(2 * (W + TW) * itemsize, 1)
            th = (budget // denom) // sub_mult * sub_mult
            if 0 < th < H:
                bh_in = bh_out = th

    grid = (pl.cdiv(R, tile_r), pl.cdiv(H, bh_in), pl.cdiv(W, bw_in))
    # Give megacore (v7x: 2 TensorCores) at least two tiles when possible.
    if math.prod(grid) == 1 and R >= 2:
        tile_r = -(-R // 2)
        grid = (pl.cdiv(R, tile_r), 1, 1)

    cparams = {"dimension_semantics": ("parallel", "parallel", "parallel")}
    needed = 2 * tile_r * (bh_in * bw_in + bh_out * bw_out) * itemsize
    if needed > 12 * 1024 * 1024:
        # Both trailing axes are padded and a single slab still exceeds the
        # scoped-VMEM default: raise the limit (stay under v7x's 64 MiB VMEM).
        # TODO(synk): tile the padded axes themselves for slabs beyond ~50 MiB.
        cparams["vmem_limit_bytes"] = min(int(needed * 1.25) + (1 << 20),
                                          56 * 1024 * 1024)

    return pl.pallas_call(
        _make_pad_kernel(bh_in, bw_in, bh_out, bw_out, off_h, off_w, pad_value),
        out_shape=jax.ShapeDtypeStruct((R, TH, TW), dtype),
        grid=grid,
        in_specs=[pl.BlockSpec((tile_r, bh_in, bw_in), lambda i, j, k: (i, j, k))],
        out_specs=pl.BlockSpec((tile_r, bh_out, bw_out), lambda i, j, k: (i, j, k)),
        compiler_params=pltpu.CompilerParams(**cparams),
    )(x3d)


# ---------------------------------------------------------------------------
# Wrapper glue (only free contiguous reshapes; no transposes).
# ---------------------------------------------------------------------------
def _compute_offset(align: str, missing: int, rng: np.random.Generator) -> int:
    if align == "left":
        return 0
    if align == "right":
        return missing
    if align == "center":
        return missing // 2
    if align == "random":
        # TODO(synk): under jax.jit this host-drawn offset is baked into the
        # compiled kernel; a scalar-prefetch offset (PrefetchScalarGridSpec +
        # pl.ds) would keep one compilation with per-call randomness.
        return int(rng.integers(0, missing + 1))
    raise ValueError(f"Invalid align={align!r}")


def _pad_one_dim(x: jax.Array, d: int, target: int, offset: int, pad_value) -> jax.Array:
    ndim = x.ndim
    shape = x.shape
    if d == ndim - 1:
        # Pad the lane axis; the second-to-last dim (if any) rides on sublanes.
        H = shape[-2] if ndim >= 2 else 1
        lead = shape[:-2] if ndim >= 2 else ()
        R = math.prod(lead)
        y = _pad_hw(x.reshape(R, H, shape[-1]), H, target, 0, offset, pad_value)
        mid = (H,) if ndim >= 2 else ()
        return y.reshape(*lead, *mid, target)
    # Pad a non-last dim along the sublane axis; the flattened trailing dims
    # stay on the (wide, lane-dense) lane axis.
    lead, tail = shape[:d], shape[d + 1:]
    R, T = math.prod(lead), math.prod(tail)
    y = _pad_hw(x.reshape(R, shape[d], T), target, T, offset, 0, pad_value)
    return y.reshape(*lead, target, *tail)


def pad_dims(
    x: jax.Array,
    target_lengths: Iterable[int],
    aligns: Iterable[str] = ("left",),
    pad_value: float = 0.0,
    dims: Iterable[int] = (-1,),
    mode: str = "constant",
    generator: Union[int, None] = None,
) -> jax.Array:
    if mode != "constant":
        # TODO(synk): reflect/replicate/circular pad modes are not implemented.
        raise NotImplementedError(f"mode={mode!r} is not supported")

    target_lengths = tuple(int(t) for t in target_lengths)
    dims = tuple(int(d) for d in dims)
    aligns = tuple(aligns)
    if len(aligns) == 1:
        aligns = aligns * len(dims)
    if not (len(target_lengths) == len(dims) == len(aligns)):
        raise ValueError("target_lengths, dims, aligns must have equal lengths")

    rng = np.random.default_rng(generator if generator is not None else None)
    ndim = x.ndim
    items = [(dim % ndim, tgt, al) for tgt, al, dim in zip(target_lengths, aligns, dims)]
    unique_dims = len({d for d, _, _ in items}) == len(items)
    out = x

    if not unique_dims:
        # Repeated dims: apply strictly sequentially to preserve semantics.
        for d, tgt, al in items:
            L = out.shape[d]
            if tgt <= L:
                continue  # pad_dims never crops
            out = _pad_one_dim(out, d, tgt, _compute_offset(al, tgt - L, rng), pad_value)
        return out

    work = {}
    for d, tgt, al in items:
        L = out.shape[d]
        if tgt <= L:
            continue  # pad_dims never crops
        work[d] = (tgt, _compute_offset(al, tgt - L, rng))
    if not work:
        return out

    last, second = ndim - 1, ndim - 2
    if last in work or (second >= 0 and second in work):
        # Fuse padding of the trailing two dims into ONE pallas_call.
        H = out.shape[second] if second >= 0 else 1
        W = out.shape[last]
        th, oh = work.pop(second) if (second >= 0 and second in work) else (H, 0)
        tw, ow = work.pop(last) if last in work else (W, 0)
        lead = out.shape[:second] if second >= 0 else ()
        R = math.prod(lead)
        y = _pad_hw(out.reshape(R, H, W), th, tw, oh, ow, pad_value)
        mid = (th,) if second >= 0 else ()
        out = y.reshape(*lead, *mid, tw)

    for d in sorted(work):
        tgt, off = work[d]
        out = _pad_one_dim(out, d, tgt, off, pad_value)
    return out


class PadDims:
    """JAX/Pallas equivalent of torchoutil.nn.PadDims (no parameters)."""

    def __init__(self, target_lengths, aligns=("left",), pad_value=0.0,
                 dims=(-1,), mode="constant", generator=None):
        self.target_lengths = target_lengths
        self.aligns = aligns
        self.pad_value = pad_value
        self.dims = dims
        self.mode = mode
        self.generator = generator

    def __call__(self, x: jax.Array) -> jax.Array:
        return pad_dims(
            x,
            target_lengths=self.target_lengths,
            aligns=self.aligns,
            pad_value=self.pad_value,
            dims=self.dims,
            mode=self.mode,
            generator=self.generator,
        )


# ---------------------------------------------------------------------------
# Demo / correctness checks.
# ---------------------------------------------------------------------------
if __name__ == "__main__":
    key = jax.random.PRNGKey(0)
    x = jax.random.normal(key, (2, 4, 16, 16), dtype=jnp.float32)

    # Case 1: pad last dim 16 -> 24, align 'left', pad_value 0.
    mod1 = PadDims(target_lengths=(24,), aligns=("left",), pad_value=0.0, dims=(-1,))
    y1 = jax.block_until_ready(mod1(x))
    ref1 = jnp.pad(x, ((0, 0), (0, 0), (0, 0), (0, 8)), constant_values=0.0)
    assert y1.shape == (2, 4, 16, 24), y1.shape
    assert y1.dtype == x.dtype
    assert jnp.allclose(y1, ref1)

    # Case 2: trailing two dims fused into ONE kernel call,
    # 'right' + 'center' aligns, nonzero pad value.
    mod2 = PadDims(target_lengths=(20, 24), aligns=("right", "center"),
                   pad_value=-1.5, dims=(-2, -1))
    y2 = jax.block_until_ready(mod2(x))
    ref2 = jnp.pad(x, ((0, 0), (0, 0), (4, 0), (0, 0)), constant_values=-1.5)
    ref2 = jnp.pad(ref2, ((0, 0), (0, 0), (0, 0), (4, 4)), constant_values=-1.5)
    assert y2.shape == (2, 4, 20, 24), y2.shape
    assert jnp.allclose(y2, ref2)

    # Case 3: pad a non-trailing dim (channels 4 -> 6, 'center'): the padded dim
    # sits on the sublane axis; the flattened 16*16 = 256-wide tail stays
    # lane-dense. No transposes anywhere.
    mod3 = PadDims(target_lengths=(6,), aligns=("center",), pad_value=2.0, dims=(1,))
    y3 = jax.block_until_ready(mod3(x))
    ref3 = jnp.pad(x, ((0, 0), (1, 1), (0, 0), (0, 0)), constant_values=2.0)
    assert y3.shape == (2, 6, 16, 16), y3.shape
    assert jnp.allclose(y3, ref3)

    # Case 4: exercise the lane-axis (128-multiple) tiling path that kicks in
    # when one [H, W] slab exceeds the per-step VMEM budget (simulated here
    # with a small budget): pad dim 1 of a 4-D tensor, tail stays lane-dense.
    _VMEM_STEP_BUDGET = 128 * 1024
    x4 = jax.random.normal(jax.random.PRNGKey(1), (2, 6, 8, 256), dtype=jnp.float32)
    mod4 = PadDims(target_lengths=(10,), aligns=("center",), pad_value=3.25, dims=(1,))
    y4 = jax.block_until_ready(mod4(x4))
    ref4 = jnp.pad(x4, ((0, 0), (2, 2), (0, 0), (0, 0)), constant_values=3.25)
    assert y4.shape == (2, 10, 8, 256), y4.shape
    assert jnp.allclose(y4, ref4)

    # Case 5: exercise the sublane-axis (8-multiple) tiling path: pad the last
    # dim while the free -2 dim gets split across grid steps.
    _VMEM_STEP_BUDGET = 40 * 1024
    x5 = jax.random.normal(jax.random.PRNGKey(2), (2, 64, 128), dtype=jnp.float32)
    mod5 = PadDims(target_lengths=(160,), aligns=("left",), pad_value=-2.0, dims=(-1,))
    y5 = jax.block_until_ready(mod5(x5))
    ref5 = jnp.pad(x5, ((0, 0), (0, 0), (0, 32)), constant_values=-2.0)
    assert y5.shape == (2, 64, 160), y5.shape
    assert jnp.allclose(y5, ref5)
    _VMEM_STEP_BUDGET = 8 * 1024 * 1024  # restore default

    print("KERNEL_OK")
</pallas_src>

<mosaic_0001>
module attributes {stable_mosaic.version = 11 : i64} {
  func.func @kernel(%arg0: i32, %arg1: i32, %arg2: i32, %arg3: memref<4x16x16xf32, #tpu.memory_space<vmem>>, %arg4: memref<4x16x24xf32, #tpu.memory_space<vmem>>) attributes {dimension_semantics = [#tpu.dimension_semantics<parallel>, #tpu.dimension_semantics<parallel>, #tpu.dimension_semantics<parallel>], iteration_bounds = array<i64: 2, 1, 1>, scalar_prefetch = 0 : i64, scratch_operands = 0 : i64, tpu.core_type = #tpu.core_type<tc>, window_params = [{transform_indices = @transform_0, window_bounds = array<i64: 4, 16, 16>}, {transform_indices = @transform_1, window_bounds = array<i64: 4, 16, 24>}]} {
    %c0 = arith.constant 0 : index
    %c0_0 = arith.constant 0 : index
    %c0_1 = arith.constant 0 : index
    %0 = vector.load %arg3[%c0, %c0_0, %c0_1] : memref<4x16x16xf32, #tpu.memory_space<vmem>>, vector<4x16x16xf32>
    %c0_2 = arith.constant 0 : index
    %c0_3 = arith.constant 0 : index
    %c0_4 = arith.constant 0 : index
    %1 = vector.load %arg4[%c0_2, %c0_3, %c0_4] : memref<4x16x24xf32, #tpu.memory_space<vmem>>, vector<4x16x16xf32>
    tpu.vector_store %arg4[%c0_2, %c0_3, %c0_4], %0 {strides = array<i32>} : memref<4x16x24xf32, #tpu.memory_space<vmem>>, vector<4x16x16xf32>,
    %cst = arith.constant 0.000000e+00 : f32
    %2 = vector.broadcast %cst : f32 to vector<4x16x8xf32>
    %c0_5 = arith.constant 0 : index
    %c0_6 = arith.constant 0 : index
    %c16 = arith.constant 16 : index
    %3 = vector.load %arg4[%c0_5, %c0_6, %c16] : memref<4x16x24xf32, #tpu.memory_space<vmem>>, vector<4x16x8xf32>
    tpu.vector_store %arg4[%c0_5, %c0_6, %c16], %2 {strides = array<i32>} : memref<4x16x24xf32, #tpu.memory_space<vmem>>, vector<4x16x8xf32>,
    return
  }
  func.func @transform_0(%arg0: i32, %arg1: i32, %arg2: i32) -> (i32, i32, i32) {
    %c0_i32 = arith.constant 0 : i32
    return %arg0, %arg1, %arg2 : i32, i32, i32
  }
  func.func @transform_1(%arg0: i32, %arg1: i32, %arg2: i32) -> (i32, i32, i32) {
    %c0_i32 = arith.constant 0 : i32
    return %arg0, %arg1, %arg2 : i32, i32, i32
  }
}

</mosaic_0001>

<bundles_post_ra>
// kernel: tpu_custom_call.1
= control target key start
LH: loop header
LB: loop body
LE: loop exit
PB: predicated region body
PF: predicated region fallthrough
CT: control target
= control target key end

     0   :  { %6 = vsyncpa [#allocation3], 0  ;;  %s663_s0 = inlined_call_operand.hbm [shape: f32[8,16,16], index: 0, kind: input, shape index: {}]   ;;  %s664_s1 = inlined_call_operand.hbm [shape: f32[8,16,24], index: 1, kind: output, shape index: {}]  }
   0x1   :  { %8 = vsyncpa [#allocation3 + $0x1], 0 }
   0x2   :  { %9 = vsyncpa [#allocation4], 0 }
   0x3   :  { %11 = vsyncpa [#allocation4 + $0x1], 0  ;;  %s527_s6 = smov 0   ;;  %s529_s7 = smov 0  }
   0x4   :  { %s531_s8 = smov 0   ;;  %s533_s9 = smov 0  }
   0x5   :  { %s535_s10 = smov 0   ;;  %s537_s11 = smov 0  }
   0x6 LB: > { %s310_s12 = sadd.s32 4294967295, %s510_s11   ;;  %s311_s13 = sadd.s32 4294967294, %s510_s11   ;;  %s510_s11 = sphi %s537_s11, %s17_s11   ;;  %s506_s10 = sphi %s535_s10, %s673_s10   ;;  %s502_s9 = sphi %s533_s9, %s672_s9   ;;  %s498_s8 = sphi %s531_s8, %s671_s8   ;;  %s494_s7 = sphi %s529_s7, %s670_s7   ;;  %s490_s6 = sphi %s527_s6, %s669_s6  }
   0x7   : > { %s36_s14 = sadd.s32 1, %s506_s10  ;;  %s47_s15 = sadd.s32 1, %s498_s8 }
   0x8   : > { %p38_p0 = scmp.ge.s32.totalorder %s36_s14, 2  ;;  %p54_p1 = scmp.ne.s32.totalorder %s498_s8, %s494_s7 }
   0x9   : > { %p55_p2 = scmp.eq.s32.totalorder %s510_s11, 0  ;;  %p60_p3 = scmp.ne.s32.totalorder %s494_s7, %s490_s6 }
   0xa   : > { %s675_s14 = smov (%p38_p0, %s36_s14), 0  ;;  %p61_p5 = scmp.eq.s32.totalorder %s310_s12, 0 }
   0xb   : > { %p568_p4 = por %p55_p2, %p54_p1  ;;  %s40_s17 = ssub.s32 %s506_s10, %s675_s14 }
   0xc   : > { %p88_p6 = scmp.eq.s32.totalorder %s310_s12, 1  ;;  %p45_p7 = scmp.eq.s32.totalorder %s40_s17, 0 }
   0xd   : > { %p574_p8 = por %p61_p5, %p60_p3  ;;  %p94_p10 = scmp.eq.s32.totalorder %s311_s13, 1 }
   0xe   : > { %p578_p9 = por %p88_p6, %p54_p1  ;;  %p313_p12 = scmp.ge.s32.totalorder %s510_s11, 2 }
   0xf   : > { %s583_s20 = scalar_select %p45_p7, %s498_s8, %s47_s15  }
  0x10   : > { %p585_p11 = por %p94_p10, %p60_p3  ;;  %p343_p13 = scmp.lt.s32.totalorder %s510_s11, 2 }
  0x11   : > { %s114_s22 = sand.u32 1, %s498_s8   ;;  %s328_s24 = sshll.u32 %s506_s10, 6 }
  0x12   : > { %s314_s23 = sshll.u32 %s114_s22, 6  ;;  %s127_s27 = scalar_lea.hbm %s663_s0, %s328_s24 }
  0x13   : > { %s118_s28 = scalar_lea.vmem [#allocation2], %s314_s23  ;;  %s128_s30 = sshll.u32 %s127_s27, 4  ;;  %s129_s30 = int_to_ptr.hbm [resolvable:$true] %s128_s30 }
  0x14   : > { %s130_s29 = sshll.u32 %s118_s28, 4  ;;  %p336_p0 = pnand %p343_p13, %p568_p4  ;;  %s131_s29 = int_to_ptr.vmem [resolvable:$true] %s130_s29 }
  0x15   : > { %p318_p1 = scmp.ge.s32.totalorder %s510_s11, 1  ;;  %s115_s2 = scalar_lea.sflag [#allocation3], %s114_s22 }
  0x16   : > { %s512_s3 = smov 128   ;;  %s513_s4 = smov 8  }
  0x17   : > { %338 = dma.hbm_to_vmem [thread:$0]  (!%p336_p0), %s129_s30, 1024, %s131_s29, %s115_s2, %s512_s3, %s512_s3, %s513_s4  }
  0x18   : > { %p138_p2 = scmp.lt.s32.totalorder %s510_s11, 3 }
  0x1a   : > { %p139_p3 = pnand %p318_p1, %p138_p2 }
  0x1b   : > { %s601_s5 = sand.u32 (!%p139_p3), 1, %s494_s7  }
  0x1c   : > { %142 = sbr.rel (%p139_p3) target bundleno = 54 (0x36), region = 24  ;;  %s319_s12 = sshll.u32 (!%p139_p3), %s601_s5, 6 }
  0x1d   : > { %s145_s13 = scalar_lea.sflag (!%p139_p3), [#allocation3], %s601_s5  ;;  %s148_s15 = scalar_lea.vmem (!%p139_p3), [#allocation2], %s319_s12 }
  0x21   : > { %481 = dma.done.wait (%p574_p8), %s145_s13, 1024  }
  0x22   : > { %483 = vsyncadd (%p574_p8), %s145_s13, 4294966272  ;;  %vm180_vm0 = vcmask 130048   ;;  %v172_v0 = vld [vmem:[%s148_s15] sm:$0xff]  ;;  %v173_v1 = vld [vmem:[%s148_s15 + $0x8] sm:$0xff]  ;;  %s167_s16 = scalar_lea.vmem [#allocation5], %s319_s12  ;;  %s330_s17 = sshll.u32 %s502_s9, 6 }
  0x23   : > { %v174_v2 = vld [vmem:[%s148_s15 + $0x10] sm:$0xff]  ;;  %181 = vst.msk [vmem:[%s167_s16] sm:$0xff] %vm180_vm0, %v172_v0  ;;  %v175_v3 = vld [vmem:[%s148_s15 + $0x18] sm:$0xff]  ;;  %v176_v4 = vld [vmem:[%s148_s15 + $0x20] sm:$0xff]  ;;  %vm189_vm1 = vcmask 195712   ;;  %s214_s23 = scalar_lea.hbm %s664_s1, %s330_s17  ;;  %v514_v8 = vmov 0.0  }
  0x24   : > { %182 = vst.msk [vmem:[%s167_s16 + $0x8] sm:$0xff] %vm180_vm0, %v173_v1  ;;  %v177_v5 = vld [vmem:[%s148_s15 + $0x28] sm:$0xff]  ;;  %v178_v6 = vld [vmem:[%s148_s15 + $0x30] sm:$0xff]  ;;  %v179_v7 = vld [vmem:[%s148_s15 + $0x38] sm:$0xff]  ;;  %s215_s24 = sshll.u32 %s167_s16, 4  ;;  %s217_s9 = sshll.u32 %s214_s23, 4  ;;  %s216_s24 = int_to_ptr.vmem [resolvable:$true] %s215_s24  ;;  %s218_s9 = int_to_ptr.hbm [resolvable:$true] %s217_s9 }
  0x25   : > { %183 = vst.msk [vmem:[%s167_s16 + $0x10] sm:$0xff] %vm180_vm0, %v174_v2  ;;  %s199_s25 = scalar_lea.sflag [#allocation4], %s601_s5  ;;  %s442_s26 = sshra.s32 %s218_s9, 4  ;;  %s443_s26 = int_to_ptr.hbm [resolvable:$true] %s442_s26 }
  0x26   : > { %184 = vst.msk [vmem:[%s167_s16 + $0x18] sm:$0xff] %vm180_vm0, %v175_v3  ;;  %s444_s27 = scalar_lea.hbm %s443_s26, 64  ;;  %s448_s30 = scalar_lea.hbm %s664_s1, 128 }
  0x27   : > { %185 = vst.msk [vmem:[%s167_s16 + $0x20] sm:$0xff] %vm180_vm0, %v176_v4  ;;  %p445_p4 = scmp.ne.s32.totalorder %s443_s26, %s444_s27  ;;  %p449_p7 = scmp.lt.s32.totalorder %s443_s26, %s664_s1 }
  0x28   : > { %186 = vst.msk [vmem:[%s167_s16 + $0x28] sm:$0xff] %vm180_vm0, %v177_v5  ;;  %p450_p8 = scmp.lt.s32.totalorder %s448_s30, %s444_s27 }
  0x29   : > { %187 = vst.msk [vmem:[%s167_s16 + $0x30] sm:$0xff] %vm180_vm0, %v178_v6  ;;  %p446_p5 = pnand %p445_p4, %p578_p9 }
  0x2a   : > { %188 = vst.msk [vmem:[%s167_s16 + $0x38] sm:$0xff] %vm180_vm0, %v179_v7  ;;  %p451_p10 = por %p450_p8, %p449_p7 }
  0x2b   : > { %190 = vst.msk [vmem:[%s167_s16] sm:$0xff] %vm189_vm1, %v514_v8  ;;  %p447_p6 = pneg %p446_p5 }
  0x2c   : > { %191 = vst.msk [vmem:[%s167_s16 + $0x8] sm:$0xff] %vm189_vm1, %v514_v8 }
  0x2d   : > { %192 = vst.msk [vmem:[%s167_s16 + $0x10] sm:$0xff] %vm189_vm1, %v514_v8  ;;  %p452_p13 = pnand %p451_p10, %p447_p6 }
  0x2e   : > { %193 = vst.msk [vmem:[%s167_s16 + $0x18] sm:$0xff] %vm189_vm1, %v514_v8 }
  0x2f   : > { %194 = vst.msk [vmem:[%s167_s16 + $0x20] sm:$0xff] %vm189_vm1, %v514_v8 }
  0x30   : > { %195 = vst.msk [vmem:[%s167_s16 + $0x28] sm:$0xff] %vm189_vm1, %v514_v8 }
  0x31   : > { %196 = vst.msk [vmem:[%s167_s16 + $0x30] sm:$0xff] %vm189_vm1, %v514_v8 }
  0x32   : > { %197 = vst.msk [vmem:[%s167_s16 + $0x38] sm:$0xff] %vm189_vm1, %v514_v8 }
  0x33   : > { %455 = shalt.err (!%p452_p13)
}
  0x34   : > { %s515_s4 = smov 128   ;;  %s516_s5 = smov 8  }
  0x35   : > { %333 = dma.vmem_to_hbm [thread:$0]  (%p578_p9), %s216_s24, 1024, %s218_s9, %s199_s25, %s515_s4, %s515_s4, %s516_s5  }
  0x36 PF: > { %s232_s12 = sand.u32 1, %s490_s6   ;;  %p340_p0 = pnand %p313_p12, %p585_p11 }
  0x37   : > { %s233_s13 = scalar_lea.sflag [#allocation4], %s232_s12 }
  0x38   : > { %p341_p1 = pneg %p340_p0 }
  0x3a   : > { %485 = dma.done.wait (%p341_p1), %s233_s13, 1024  }
  0x3b   : > { %487 = vsyncadd (%p341_p1), %s233_s13, 4294966272  ;;  %s17_s11 = sadd.s32 1, %s510_s11   ;;  %s669_s6 = smov %s494_s7 }
  0x3c   : > { %p14_p2 = scmp.ge.s32.totalorder %s17_s11, 4   ;;  %s670_s7 = smov %s498_s8 }
  0x3d   : > { %s671_s8 = smov %s583_s20  ;;  %s672_s9 = smov %s506_s10 }
  0x3e   : > { %s673_s10 = smov %s675_s14  ;;  %16 = sbr.rel (!%p14_p2) target bundleno = 6 (0x6), region = 69 }
  0x43   :  { %239 = vsyncpa [#allocation3], 1 }
  0x44   :  { %241 = vsyncpa [#allocation3 + $0x1], 1 }
  0x45   :  { %242 = vsyncpa [#allocation4], 1 }
  0x46   :  { %244 = vsyncpa [#allocation4 + $0x1], 1 }

</bundles_post_ra>
